<compile_context>
chip_gen: v6e
topology: v6e:2x2x1
jax: 0.10.0
libtpu: 0.0.40
codegen_flags: <defaults>
</compile_context>

<pallas_src>
import functools

import jax
import jax.numpy as jnp
from jax import lax
from jax.experimental import pallas as pl
from jax.experimental.pallas import tpu as pltpu

D_MODEL = 32
NUM_HEADS = 4
D_FF = 64
HEAD_DIM = D_MODEL // NUM_HEADS
EPS = 1e-5  # nn.LayerNorm default eps


def _layer_norm(x, gamma, beta):
    mu = jnp.mean(x, axis=-1, keepdims=True)
    var = jnp.mean((x - mu) ** 2, axis=-1, keepdims=True)  # biased var, like PyTorch LN
    return (x - mu) * lax.rsqrt(var + EPS) * gamma + beta


def transformer_block_kernel(
    x_ref,
    wqkv_ref, bqkv_ref,            # fused q|k|v projection: (D, 3D), (1, 3D)
    wo_ref, bo_ref,
    g1_ref, be1_ref,
    w1_ref, b1_ref, w2_ref, b2_ref,
    g2_ref, be2_ref,
    o_ref,
    ctx_ref,                       # VMEM scratch (B*S, D): per-head context slab
    *, batch, seq,
):
    x = x_ref[...]                                            # (B*S, D)

    # ---- fused Q/K/V projection: one MXU push + one bias add instead of three ----
    qkv = jnp.dot(x, wqkv_ref[...], preferred_element_type=jnp.float32) + bqkv_ref[...]
    q = qkv[:, 0 * D_MODEL:1 * D_MODEL]
    k = qkv[:, 1 * D_MODEL:2 * D_MODEL]
    v = qkv[:, 2 * D_MODEL:3 * D_MODEL]

    # ---- multi-head self attention (q = k = v = x, mask = None) ----
    # Score / PV matmuls stay per-(batch, head) so tokens never mix across batch
    # elements, but all B*H score blocks are stacked along sublanes so softmax
    # (max / exp / sum / reciprocal) runs exactly once.
    scale = HEAD_DIM ** (-0.5)
    score_blocks = []
    for b in range(batch):                                    # static unrolled
        r = slice(b * seq, (b + 1) * seq)
        for h in range(NUM_HEADS):
            c = slice(h * HEAD_DIM, (h + 1) * HEAD_DIM)
            # q_h @ k_h^T via dot_general: no materialized transpose of k.
            score_blocks.append(
                lax.dot_general(q[r, c], k[r, c],
                                (((1,), (1,)), ((), ())),
                                preferred_element_type=jnp.float32))
    s = jnp.concatenate(score_blocks, axis=0) * scale         # (B*H*S, S)
    s = s - jnp.max(s, axis=-1, keepdims=True)                # stable softmax
    p = jnp.exp(s)
    # EUP reciprocal instead of a VPU divide chain (approx=False keeps f32 accuracy).
    p = p * pl.reciprocal(jnp.sum(p, axis=-1, keepdims=True), approx=False)

    for b in range(batch):
        r = slice(b * seq, (b + 1) * seq)
        for h in range(NUM_HEADS):
            c = slice(h * HEAD_DIM, (h + 1) * HEAD_DIM)
            blk = (b * NUM_HEADS + h) * seq
            # Write each head's context straight into the scratch slab
            # (no lane-axis concatenate of 8-wide head chunks).
            ctx_ref[r, c] = jnp.dot(p[blk:blk + seq, :], v[r, c],
                                    preferred_element_type=jnp.float32)

    attn_out = jnp.dot(ctx_ref[...], wo_ref[...],
                       preferred_element_type=jnp.float32) + bo_ref[...]

    # ---- residual + LayerNorm 1 ----
    y = _layer_norm(x + attn_out, g1_ref[...], be1_ref[...])

    # ---- feed forward ----
    # TODO(synk): PyTorch F.gelu defaults to the exact erf-based GELU; erf has no
    # Mosaic lowering here, so the tanh approximation is used (max abs diff ~1e-3).
    h1 = jnp.dot(y, w1_ref[...], preferred_element_type=jnp.float32) + b1_ref[...]
    h1 = jax.nn.gelu(h1, approximate=True)
    ff = jnp.dot(h1, w2_ref[...], preferred_element_type=jnp.float32) + b2_ref[...]

    # ---- residual + LayerNorm 2 ----
    o_ref[...] = _layer_norm(y + ff, g2_ref[...], be2_ref[...]).astype(o_ref.dtype)


def transformer_block(x, params):
    """x: (B, S, D) float32; params: list matching TransformerBlock parameters."""
    (wq, bq, wk, bk, wv, bv, wo, bo,
     g1, be1, w1, b1, w2, b2, g2, be2) = params
    B, S, D = x.shape

    # Host-side fusion of the three projection weights into one (D, 3D) matmul.
    wqkv = jnp.concatenate([wq, wk, wv], axis=1)
    bqkv = jnp.concatenate([bq, bk, bv], axis=1)

    # Fold batch into rows: single invocation, no grid, no per-step overhead.
    x2 = x.reshape(B * S, D)

    kernel = functools.partial(transformer_block_kernel, batch=B, seq=S)
    out = pl.pallas_call(
        kernel,
        out_shape=jax.ShapeDtypeStruct((B * S, D), x.dtype),
        # Full-array VMEM blocks for every operand (no grid needed at this size).
        scratch_shapes=[pltpu.VMEM((B * S, D), jnp.float32)],
        # TODO(synk): at these toy shapes (last dim 32) the output store is a couple
        # of masked vst; a lane-dense (B, S*D) relayout only pays off at larger D.
    )(x2, wqkv, bqkv, wo, bo, g1, be1, w1, b1, w2, b2, g2, be2)
    return out.reshape(B, S, D)


def init_params(key):
    """Deterministic synthetic parameters (shapes per TransformerBlock.__init__)."""
    ks = jax.random.split(key, 6)

    def linear(k, din, dout):
        k1, k2 = jax.random.split(k)
        w = jax.random.normal(k1, (din, dout), jnp.float32) * 0.05
        b = jax.random.normal(k2, (1, dout), jnp.float32) * 0.05
        return w, b

    wq, bq = linear(ks[0], D_MODEL, D_MODEL)
    wk, bk = linear(ks[1], D_MODEL, D_MODEL)
    wv, bv = linear(ks[2], D_MODEL, D_MODEL)
    wo, bo = linear(ks[3], D_MODEL, D_MODEL)
    w1, b1 = linear(ks[4], D_MODEL, D_FF)
    w2, b2 = linear(ks[5], D_FF, D_MODEL)

    g1 = jnp.ones((1, D_MODEL), jnp.float32)
    be1 = jnp.zeros((1, D_MODEL), jnp.float32)
    g2 = jnp.ones((1, D_MODEL), jnp.float32)
    be2 = jnp.zeros((1, D_MODEL), jnp.float32)

    return [wq, bq, wk, bk, wv, bv, wo, bo,
            g1, be1,
            w1, b1, w2, b2,
            g2, be2]


if __name__ == "__main__":
    key = jax.random.PRNGKey(0)
    kx, kp = jax.random.split(key)

    B, S = 2, 8
    x = jax.random.normal(kx, (B, S, D_MODEL), jnp.float32)
    params = init_params(kp)

    out = transformer_block(x, params)
    out = jax.block_until_ready(out)

    assert out.shape == (B, S, D_MODEL)
    assert out.dtype == jnp.float32
    assert bool(jnp.all(jnp.isfinite(out)))
    print("KERNEL_OK")
</pallas_src>

<mosaic_0001>
module attributes {stable_mosaic.version = 11 : i64} {
  func.func @transformer_block_kernel(%arg0: memref<16x32xf32, #tpu.memory_space<vmem>>, %arg1: memref<32x96xf32, #tpu.memory_space<vmem>>, %arg2: memref<1x96xf32, #tpu.memory_space<vmem>>, %arg3: memref<32x32xf32, #tpu.memory_space<vmem>>, %arg4: memref<1x32xf32, #tpu.memory_space<vmem>>, %arg5: memref<1x32xf32, #tpu.memory_space<vmem>>, %arg6: memref<1x32xf32, #tpu.memory_space<vmem>>, %arg7: memref<32x64xf32, #tpu.memory_space<vmem>>, %arg8: memref<1x64xf32, #tpu.memory_space<vmem>>, %arg9: memref<64x32xf32, #tpu.memory_space<vmem>>, %arg10: memref<1x32xf32, #tpu.memory_space<vmem>>, %arg11: memref<1x32xf32, #tpu.memory_space<vmem>>, %arg12: memref<1x32xf32, #tpu.memory_space<vmem>>, %arg13: memref<16x32xf32, #tpu.memory_space<vmem>>, %arg14: memref<16x32xf32, #tpu.memory_space<vmem>>) attributes {dimension_semantics = [], scalar_prefetch = 0 : i64, scratch_operands = 1 : i64, tpu.core_type = #tpu.core_type<tc>} {
    %c0 = arith.constant 0 : index
    %c0_0 = arith.constant 0 : index
    %0 = vector.load %arg0[%c0, %c0_0] : memref<16x32xf32, #tpu.memory_space<vmem>>, vector<16x32xf32>
    %c0_1 = arith.constant 0 : index
    %c0_2 = arith.constant 0 : index
    %1 = vector.load %arg1[%c0_1, %c0_2] : memref<32x96xf32, #tpu.memory_space<vmem>>, vector<32x96xf32>
    %cst = arith.constant dense<0.000000e+00> : vector<16x96xf32>
    %2 = tpu.matmul %0, %1, %cst {dimension_numbers = #tpu.dot_dimension_numbers<[1], [0], [0], [1], [0, 0, 1, 1], [], []>} : vector<16x32xf32>, vector<32x96xf32>, vector<16x96xf32> -> vector<16x96xf32>
    %c0_3 = arith.constant 0 : index
    %c0_4 = arith.constant 0 : index
    %3 = vector.load %arg2[%c0_3, %c0_4] : memref<1x96xf32, #tpu.memory_space<vmem>>, vector<1x96xf32>
    %4 = vector.broadcast %3 : vector<1x96xf32> to vector<16x96xf32>
    %5 = arith.addf %2, %4 : vector<16x96xf32>
    %6 = vector.extract_strided_slice %5 {offsets = [0, 0], sizes = [16, 32], strides = [1, 1]} : vector<16x96xf32> to vector<16x32xf32>
    %7 = vector.extract_strided_slice %5 {offsets = [0, 32], sizes = [16, 32], strides = [1, 1]} : vector<16x96xf32> to vector<16x32xf32>
    %8 = vector.extract_strided_slice %5 {offsets = [0, 64], sizes = [16, 32], strides = [1, 1]} : vector<16x96xf32> to vector<16x32xf32>
    %9 = vector.extract_strided_slice %6 {offsets = [0, 0], sizes = [8, 8], strides = [1, 1]} : vector<16x32xf32> to vector<8x8xf32>
    %10 = vector.extract_strided_slice %7 {offsets = [0, 0], sizes = [8, 8], strides = [1, 1]} : vector<16x32xf32> to vector<8x8xf32>
    %cst_5 = arith.constant dense<0.000000e+00> : vector<8x8xf32>
    %11 = tpu.matmul %9, %10, %cst_5 {dimension_numbers = #tpu.dot_dimension_numbers<[1], [1], [0], [0], [0, 0, 1, 0], [], []>} : vector<8x8xf32>, vector<8x8xf32>, vector<8x8xf32> -> vector<8x8xf32>
    %12 = vector.extract_strided_slice %6 {offsets = [0, 8], sizes = [8, 8], strides = [1, 1]} : vector<16x32xf32> to vector<8x8xf32>
    %13 = vector.extract_strided_slice %7 {offsets = [0, 8], sizes = [8, 8], strides = [1, 1]} : vector<16x32xf32> to vector<8x8xf32>
    %cst_6 = arith.constant dense<0.000000e+00> : vector<8x8xf32>
    %14 = tpu.matmul %12, %13, %cst_6 {dimension_numbers = #tpu.dot_dimension_numbers<[1], [1], [0], [0], [0, 0, 1, 0], [], []>} : vector<8x8xf32>, vector<8x8xf32>, vector<8x8xf32> -> vector<8x8xf32>
    %15 = vector.extract_strided_slice %6 {offsets = [0, 16], sizes = [8, 8], strides = [1, 1]} : vector<16x32xf32> to vector<8x8xf32>
    %16 = vector.extract_strided_slice %7 {offsets = [0, 16], sizes = [8, 8], strides = [1, 1]} : vector<16x32xf32> to vector<8x8xf32>
    %cst_7 = arith.constant dense<0.000000e+00> : vector<8x8xf32>
    %17 = tpu.matmul %15, %16, %cst_7 {dimension_numbers = #tpu.dot_dimension_numbers<[1], [1], [0], [0], [0, 0, 1, 0], [], []>} : vector<8x8xf32>, vector<8x8xf32>, vector<8x8xf32> -> vector<8x8xf32>
    %18 = vector.extract_strided_slice %6 {offsets = [0, 24], sizes = [8, 8], strides = [1, 1]} : vector<16x32xf32> to vector<8x8xf32>
    %19 = vector.extract_strided_slice %7 {offsets = [0, 24], sizes = [8, 8], strides = [1, 1]} : vector<16x32xf32> to vector<8x8xf32>
    %cst_8 = arith.constant dense<0.000000e+00> : vector<8x8xf32>
    %20 = tpu.matmul %18, %19, %cst_8 {dimension_numbers = #tpu.dot_dimension_numbers<[1], [1], [0], [0], [0, 0, 1, 0], [], []>} : vector<8x8xf32>, vector<8x8xf32>, vector<8x8xf32> -> vector<8x8xf32>
    %21 = vector.extract_strided_slice %6 {offsets = [8, 0], sizes = [8, 8], strides = [1, 1]} : vector<16x32xf32> to vector<8x8xf32>
    %22 = vector.extract_strided_slice %7 {offsets = [8, 0], sizes = [8, 8], strides = [1, 1]} : vector<16x32xf32> to vector<8x8xf32>
    %cst_9 = arith.constant dense<0.000000e+00> : vector<8x8xf32>
    %23 = tpu.matmul %21, %22, %cst_9 {dimension_numbers = #tpu.dot_dimension_numbers<[1], [1], [0], [0], [0, 0, 1, 0], [], []>} : vector<8x8xf32>, vector<8x8xf32>, vector<8x8xf32> -> vector<8x8xf32>
    %24 = vector.extract_strided_slice %6 {offsets = [8, 8], sizes = [8, 8], strides = [1, 1]} : vector<16x32xf32> to vector<8x8xf32>
    %25 = vector.extract_strided_slice %7 {offsets = [8, 8], sizes = [8, 8], strides = [1, 1]} : vector<16x32xf32> to vector<8x8xf32>
    %cst_10 = arith.constant dense<0.000000e+00> : vector<8x8xf32>
    %26 = tpu.matmul %24, %25, %cst_10 {dimension_numbers = #tpu.dot_dimension_numbers<[1], [1], [0], [0], [0, 0, 1, 0], [], []>} : vector<8x8xf32>, vector<8x8xf32>, vector<8x8xf32> -> vector<8x8xf32>
    %27 = vector.extract_strided_slice %6 {offsets = [8, 16], sizes = [8, 8], strides = [1, 1]} : vector<16x32xf32> to vector<8x8xf32>
    %28 = vector.extract_strided_slice %7 {offsets = [8, 16], sizes = [8, 8], strides = [1, 1]} : vector<16x32xf32> to vector<8x8xf32>
    %cst_11 = arith.constant dense<0.000000e+00> : vector<8x8xf32>
    %29 = tpu.matmul %27, %28, %cst_11 {dimension_numbers = #tpu.dot_dimension_numbers<[1], [1], [0], [0], [0, 0, 1, 0], [], []>} : vector<8x8xf32>, vector<8x8xf32>, vector<8x8xf32> -> vector<8x8xf32>
    %30 = vector.extract_strided_slice %6 {offsets = [8, 24], sizes = [8, 8], strides = [1, 1]} : vector<16x32xf32> to vector<8x8xf32>
    %31 = vector.extract_strided_slice %7 {offsets = [8, 24], sizes = [8, 8], strides = [1, 1]} : vector<16x32xf32> to vector<8x8xf32>
    %cst_12 = arith.constant dense<0.000000e+00> : vector<8x8xf32>
    %32 = tpu.matmul %30, %31, %cst_12 {dimension_numbers = #tpu.dot_dimension_numbers<[1], [1], [0], [0], [0, 0, 1, 0], [], []>} : vector<8x8xf32>, vector<8x8xf32>, vector<8x8xf32> -> vector<8x8xf32>
    %33 = tpu.concatenate %11, %14, %17, %20, %23, %26, %29, %32 in 0 : vector<8x8xf32>, vector<8x8xf32>, vector<8x8xf32>, vector<8x8xf32>, vector<8x8xf32>, vector<8x8xf32>, vector<8x8xf32>, vector<8x8xf32> -> vector<64x8xf32>
    %cst_13 = arith.constant 0.353553385 : f32
    %34 = vector.broadcast %cst_13 : f32 to vector<64x8xf32>
    %35 = arith.mulf %33, %34 : vector<64x8xf32>
    %cst_14 = arith.constant dense<0xFF800000> : vector<64xf32>
    %36 = vector.multi_reduction <maximumf>, %35, %cst_14 [1] : vector<64x8xf32> to vector<64xf32>
    %37 = vector.shape_cast %36 : vector<64xf32> to vector<64x1xf32>
    %38 = vector.broadcast %37 : vector<64x1xf32> to vector<64x8xf32>
    %39 = arith.subf %35, %38 : vector<64x8xf32>
    %40 = math.exp %39 : vector<64x8xf32>
    %cst_15 = arith.constant dense<0.000000e+00> : vector<64xf32>
    %41 = vector.multi_reduction <add>, %40, %cst_15 [1] : vector<64x8xf32> to vector<64xf32>
    %42 = vector.shape_cast %41 : vector<64xf32> to vector<64x1xf32>
    %43 = tpu.reciprocal %42 : vector<64x1xf32> -> vector<64x1xf32>
    %44 = vector.broadcast %43 : vector<64x1xf32> to vector<64x8xf32>
    %45 = arith.mulf %40, %44 : vector<64x8xf32>
    %46 = vector.extract_strided_slice %45 {offsets = [0, 0], sizes = [8, 8], strides = [1, 1]} : vector<64x8xf32> to vector<8x8xf32>
    %47 = vector.extract_strided_slice %8 {offsets = [0, 0], sizes = [8, 8], strides = [1, 1]} : vector<16x32xf32> to vector<8x8xf32>
    %cst_16 = arith.constant dense<0.000000e+00> : vector<8x8xf32>
    %48 = tpu.matmul %46, %47, %cst_16 {dimension_numbers = #tpu.dot_dimension_numbers<[1], [0], [0], [1], [0, 0, 1, 1], [], []>} : vector<8x8xf32>, vector<8x8xf32>, vector<8x8xf32> -> vector<8x8xf32>
    %c0_17 = arith.constant 0 : index
    %c0_18 = arith.constant 0 : index
    %49 = vector.load %arg14[%c0_17, %c0_18] : memref<16x32xf32, #tpu.memory_space<vmem>>, vector<8x8xf32>
    tpu.vector_store %arg14[%c0_17, %c0_18], %48 {strides = array<i32>} : memref<16x32xf32, #tpu.memory_space<vmem>>, vector<8x8xf32>,
    %50 = vector.extract_strided_slice %45 {offsets = [8, 0], sizes = [8, 8], strides = [1, 1]} : vector<64x8xf32> to vector<8x8xf32>
    %51 = vector.extract_strided_slice %8 {offsets = [0, 8], sizes = [8, 8], strides = [1, 1]} : vector<16x32xf32> to vector<8x8xf32>
    %cst_19 = arith.constant dense<0.000000e+00> : vector<8x8xf32>
    %52 = tpu.matmul %50, %51, %cst_19 {dimension_numbers = #tpu.dot_dimension_numbers<[1], [0], [0], [1], [0, 0, 1, 1], [], []>} : vector<8x8xf32>, vector<8x8xf32>, vector<8x8xf32> -> vector<8x8xf32>
    %c0_20 = arith.constant 0 : index
    %c8 = arith.constant 8 : index
    %53 = vector.load %arg14[%c0_20, %c8] : memref<16x32xf32, #tpu.memory_space<vmem>>, vector<8x8xf32>
    tpu.vector_store %arg14[%c0_20, %c8], %52 {strides = array<i32>} : memref<16x32xf32, #tpu.memory_space<vmem>>, vector<8x8xf32>,
    %54 = vector.extract_strided_slice %45 {offsets = [16, 0], sizes = [8, 8], strides = [1, 1]} : vector<64x8xf32> to vector<8x8xf32>
    %55 = vector.extract_strided_slice %8 {offsets = [0, 16], sizes = [8, 8], strides = [1, 1]} : vector<16x32xf32> to vector<8x8xf32>
    %cst_21 = arith.constant dense<0.000000e+00> : vector<8x8xf32>
    %56 = tpu.matmul %54, %55, %cst_21 {dimension_numbers = #tpu.dot_dimension_numbers<[1], [0], [0], [1], [0, 0, 1, 1], [], []>} : vector<8x8xf32>, vector<8x8xf32>, vector<8x8xf32> -> vector<8x8xf32>
    %c0_22 = arith.constant 0 : index
    %c16 = arith.constant 16 : index
    %57 = vector.load %arg14[%c0_22, %c16] : memref<16x32xf32, #tpu.memory_space<vmem>>, vector<8x8xf32>
    tpu.vector_store %arg14[%c0_22, %c16], %56 {strides = array<i32>} : memref<16x32xf32, #tpu.memory_space<vmem>>, vector<8x8xf32>,
    %58 = vector.extract_strided_slice %45 {offsets = [24, 0], sizes = [8, 8], strides = [1, 1]} : vector<64x8xf32> to vector<8x8xf32>
    %59 = vector.extract_strided_slice %8 {offsets = [0, 24], sizes = [8, 8], strides = [1, 1]} : vector<16x32xf32> to vector<8x8xf32>
    %cst_23 = arith.constant dense<0.000000e+00> : vector<8x8xf32>
    %60 = tpu.matmul %58, %59, %cst_23 {dimension_numbers = #tpu.dot_dimension_numbers<[1], [0], [0], [1], [0, 0, 1, 1], [], []>} : vector<8x8xf32>, vector<8x8xf32>, vector<8x8xf32> -> vector<8x8xf32>
    %c0_24 = arith.constant 0 : index
    %c24 = arith.constant 24 : index
    %61 = vector.load %arg14[%c0_24, %c24] : memref<16x32xf32, #tpu.memory_space<vmem>>, vector<8x8xf32>
    tpu.vector_store %arg14[%c0_24, %c24], %60 {strides = array<i32>} : memref<16x32xf32, #tpu.memory_space<vmem>>, vector<8x8xf32>,
    %62 = vector.extract_strided_slice %45 {offsets = [32, 0], sizes = [8, 8], strides = [1, 1]} : vector<64x8xf32> to vector<8x8xf32>
    %63 = vector.extract_strided_slice %8 {offsets = [8, 0], sizes = [8, 8], strides = [1, 1]} : vector<16x32xf32> to vector<8x8xf32>
    %cst_25 = arith.constant dense<0.000000e+00> : vector<8x8xf32>
    %64 = tpu.matmul %62, %63, %cst_25 {dimension_numbers = #tpu.dot_dimension_numbers<[1], [0], [0], [1], [0, 0, 1, 1], [], []>} : vector<8x8xf32>, vector<8x8xf32>, vector<8x8xf32> -> vector<8x8xf32>
    %c8_26 = arith.constant 8 : index
    %c0_27 = arith.constant 0 : index
    %65 = vector.load %arg14[%c8_26, %c0_27] : memref<16x32xf32, #tpu.memory_space<vmem>>, vector<8x8xf32>
    tpu.vector_store %arg14[%c8_26, %c0_27], %64 {strides = array<i32>} : memref<16x32xf32, #tpu.memory_space<vmem>>, vector<8x8xf32>,
    %66 = vector.extract_strided_slice %45 {offsets = [40, 0], sizes = [8, 8], strides = [1, 1]} : vector<64x8xf32> to vector<8x8xf32>
    %67 = vector.extract_strided_slice %8 {offsets = [8, 8], sizes = [8, 8], strides = [1, 1]} : vector<16x32xf32> to vector<8x8xf32>
    %cst_28 = arith.constant dense<0.000000e+00> : vector<8x8xf32>
    %68 = tpu.matmul %66, %67, %cst_28 {dimension_numbers = #tpu.dot_dimension_numbers<[1], [0], [0], [1], [0, 0, 1, 1], [], []>} : vector<8x8xf32>, vector<8x8xf32>, vector<8x8xf32> -> vector<8x8xf32>
    %c8_29 = arith.constant 8 : index
    %c8_30 = arith.constant 8 : index
    %69 = vector.load %arg14[%c8_29, %c8_30] : memref<16x32xf32, #tpu.memory_space<vmem>>, vector<8x8xf32>
    tpu.vector_store %arg14[%c8_29, %c8_30], %68 {strides = array<i32>} : memref<16x32xf32, #tpu.memory_space<vmem>>, vector<8x8xf32>,
    %70 = vector.extract_strided_slice %45 {offsets = [48, 0], sizes = [8, 8], strides = [1, 1]} : vector<64x8xf32> to vector<8x8xf32>
    %71 = vector.extract_strided_slice %8 {offsets = [8, 16], sizes = [8, 8], strides = [1, 1]} : vector<16x32xf32> to vector<8x8xf32>
    %cst_31 = arith.constant dense<0.000000e+00> : vector<8x8xf32>
    %72 = tpu.matmul %70, %71, %cst_31 {dimension_numbers = #tpu.dot_dimension_numbers<[1], [0], [0], [1], [0, 0, 1, 1], [], []>} : vector<8x8xf32>, vector<8x8xf32>, vector<8x8xf32> -> vector<8x8xf32>
    %c8_32 = arith.constant 8 : index
    %c16_33 = arith.constant 16 : index
    %73 = vector.load %arg14[%c8_32, %c16_33] : memref<16x32xf32, #tpu.memory_space<vmem>>, vector<8x8xf32>
    tpu.vector_store %arg14[%c8_32, %c16_33], %72 {strides = array<i32>} : memref<16x32xf32, #tpu.memory_space<vmem>>, vector<8x8xf32>,
    %74 = vector.extract_strided_slice %45 {offsets = [56, 0], sizes = [8, 8], strides = [1, 1]} : vector<64x8xf32> to vector<8x8xf32>
    %75 = vector.extract_strided_slice %8 {offsets = [8, 24], sizes = [8, 8], strides = [1, 1]} : vector<16x32xf32> to vector<8x8xf32>
    %cst_34 = arith.constant dense<0.000000e+00> : vector<8x8xf32>
    %76 = tpu.matmul %74, %75, %cst_34 {dimension_numbers = #tpu.dot_dimension_numbers<[1], [0], [0], [1], [0, 0, 1, 1], [], []>} : vector<8x8xf32>, vector<8x8xf32>, vector<8x8xf32> -> vector<8x8xf32>
    %c8_35 = arith.constant 8 : index
    %c24_36 = arith.constant 24 : index
    %77 = vector.load %arg14[%c8_35, %c24_36] : memref<16x32xf32, #tpu.memory_space<vmem>>, vector<8x8xf32>
    tpu.vector_store %arg14[%c8_35, %c24_36], %76 {strides = array<i32>} : memref<16x32xf32, #tpu.memory_space<vmem>>, vector<8x8xf32>,
    %c0_37 = arith.constant 0 : index
    %c0_38 = arith.constant 0 : index
    %78 = vector.load %arg14[%c0_37, %c0_38] : memref<16x32xf32, #tpu.memory_space<vmem>>, vector<16x32xf32>
    %c0_39 = arith.constant 0 : index
    %c0_40 = arith.constant 0 : index
    %79 = vector.load %arg3[%c0_39, %c0_40] : memref<32x32xf32, #tpu.memory_space<vmem>>, vector<32x32xf32>
    %cst_41 = arith.constant dense<0.000000e+00> : vector<16x32xf32>
    %80 = tpu.matmul %78, %79, %cst_41 {dimension_numbers = #tpu.dot_dimension_numbers<[1], [0], [0], [1], [0, 0, 1, 1], [], []>} : vector<16x32xf32>, vector<32x32xf32>, vector<16x32xf32> -> vector<16x32xf32>
    %c0_42 = arith.constant 0 : index
    %c0_43 = arith.constant 0 : index
    %81 = vector.load %arg4[%c0_42, %c0_43] : memref<1x32xf32, #tpu.memory_space<vmem>>, vector<1x32xf32>
    %82 = vector.broadcast %81 : vector<1x32xf32> to vector<16x32xf32>
    %83 = arith.addf %80, %82 : vector<16x32xf32>
    %84 = arith.addf %0, %83 : vector<16x32xf32>
    %c0_44 = arith.constant 0 : index
    %c0_45 = arith.constant 0 : index
    %85 = vector.load %arg5[%c0_44, %c0_45] : memref<1x32xf32, #tpu.memory_space<vmem>>, vector<1x32xf32>
    %c0_46 = arith.constant 0 : index
    %c0_47 = arith.constant 0 : index
    %86 = vector.load %arg6[%c0_46, %c0_47] : memref<1x32xf32, #tpu.memory_space<vmem>>, vector<1x32xf32>
    %cst_48 = arith.constant dense<0.000000e+00> : vector<16xf32>
    %87 = vector.multi_reduction <add>, %84, %cst_48 [1] : vector<16x32xf32> to vector<16xf32>
    %88 = vector.shape_cast %87 : vector<16xf32> to vector<16x1xf32>
    %cst_49 = arith.constant 3.200000e+01 : f32
    %89 = vector.broadcast %cst_49 : f32 to vector<16x1xf32>
    %90 = arith.divf %88, %89 : vector<16x1xf32>
    %91 = vector.broadcast %90 : vector<16x1xf32> to vector<16x32xf32>
    %92 = arith.subf %84, %91 : vector<16x32xf32>
    %93 = arith.mulf %92, %92 : vector<16x32xf32>
    %cst_50 = arith.constant dense<0.000000e+00> : vector<16xf32>
    %94 = vector.multi_reduction <add>, %93, %cst_50 [1] : vector<16x32xf32> to vector<16xf32>
    %95 = vector.shape_cast %94 : vector<16xf32> to vector<16x1xf32>
    %cst_51 = arith.constant 3.200000e+01 : f32
    %96 = vector.broadcast %cst_51 : f32 to vector<16x1xf32>
    %97 = arith.divf %95, %96 : vector<16x1xf32>
    %98 = vector.broadcast %90 : vector<16x1xf32> to vector<16x32xf32>
    %99 = arith.subf %84, %98 : vector<16x32xf32>
    %cst_52 = arith.constant 9.99999974E-6 : f32
    %100 = vector.broadcast %cst_52 : f32 to vector<16x1xf32>
    %101 = arith.addf %97, %100 : vector<16x1xf32>
    %102 = math.rsqrt %101 : vector<16x1xf32>
    %103 = vector.broadcast %102 : vector<16x1xf32> to vector<16x32xf32>
    %104 = arith.mulf %99, %103 : vector<16x32xf32>
    %105 = vector.broadcast %85 : vector<1x32xf32> to vector<16x32xf32>
    %106 = arith.mulf %104, %105 : vector<16x32xf32>
    %107 = vector.broadcast %86 : vector<1x32xf32> to vector<16x32xf32>
    %108 = arith.addf %106, %107 : vector<16x32xf32>
    %c0_53 = arith.constant 0 : index
    %c0_54 = arith.constant 0 : index
    %109 = vector.load %arg7[%c0_53, %c0_54] : memref<32x64xf32, #tpu.memory_space<vmem>>, vector<32x64xf32>
    %cst_55 = arith.constant dense<0.000000e+00> : vector<16x64xf32>
    %110 = tpu.matmul %108, %109, %cst_55 {dimension_numbers = #tpu.dot_dimension_numbers<[1], [0], [0], [1], [0, 0, 1, 1], [], []>} : vector<16x32xf32>, vector<32x64xf32>, vector<16x64xf32> -> vector<16x64xf32>
    %c0_56 = arith.constant 0 : index
    %c0_57 = arith.constant 0 : index
    %111 = vector.load %arg8[%c0_56, %c0_57] : memref<1x64xf32, #tpu.memory_space<vmem>>, vector<1x64xf32>
    %112 = vector.broadcast %111 : vector<1x64xf32> to vector<16x64xf32>
    %113 = arith.addf %110, %112 : vector<16x64xf32>
    %114 = arith.mulf %113, %113 : vector<16x64xf32>
    %115 = arith.mulf %113, %114 : vector<16x64xf32>
    %cst_58 = arith.constant 4.471500e-02 : f32
    %116 = vector.broadcast %cst_58 : f32 to vector<16x64xf32>
    %117 = arith.mulf %116, %115 : vector<16x64xf32>
    %118 = arith.addf %113, %117 : vector<16x64xf32>
    %cst_59 = arith.constant 0.797884583 : f32
    %119 = vector.broadcast %cst_59 : f32 to vector<16x64xf32>
    %120 = arith.mulf %119, %118 : vector<16x64xf32>
    %121 = math.tanh %120 : vector<16x64xf32>
    %cst_60 = arith.constant 1.000000e+00 : f32
    %122 = vector.broadcast %cst_60 : f32 to vector<16x64xf32>
    %123 = arith.addf %122, %121 : vector<16x64xf32>
    %cst_61 = arith.constant 5.000000e-01 : f32
    %124 = vector.broadcast %cst_61 : f32 to vector<16x64xf32>
    %125 = arith.mulf %124, %123 : vector<16x64xf32>
    %126 = arith.mulf %113, %125 : vector<16x64xf32>
    %c0_62 = arith.constant 0 : index
    %c0_63 = arith.constant 0 : index
    %127 = vector.load %arg9[%c0_62, %c0_63] : memref<64x32xf32, #tpu.memory_space<vmem>>, vector<64x32xf32>
    %cst_64 = arith.constant dense<0.000000e+00> : vector<16x32xf32>
    %128 = tpu.matmul %126, %127, %cst_64 {dimension_numbers = #tpu.dot_dimension_numbers<[1], [0], [0], [1], [0, 0, 1, 1], [], []>} : vector<16x64xf32>, vector<64x32xf32>, vector<16x32xf32> -> vector<16x32xf32>
    %c0_65 = arith.constant 0 : index
    %c0_66 = arith.constant 0 : index
    %129 = vector.load %arg10[%c0_65, %c0_66] : memref<1x32xf32, #tpu.memory_space<vmem>>, vector<1x32xf32>
    %130 = vector.broadcast %129 : vector<1x32xf32> to vector<16x32xf32>
    %131 = arith.addf %128, %130 : vector<16x32xf32>
    %132 = arith.addf %108, %131 : vector<16x32xf32>
    %c0_67 = arith.constant 0 : index
    %c0_68 = arith.constant 0 : index
    %133 = vector.load %arg11[%c0_67, %c0_68] : memref<1x32xf32, #tpu.memory_space<vmem>>, vector<1x32xf32>
    %c0_69 = arith.constant 0 : index
    %c0_70 = arith.constant 0 : index
    %134 = vector.load %arg12[%c0_69, %c0_70] : memref<1x32xf32, #tpu.memory_space<vmem>>, vector<1x32xf32>
    %cst_71 = arith.constant dense<0.000000e+00> : vector<16xf32>
    %135 = vector.multi_reduction <add>, %132, %cst_71 [1] : vector<16x32xf32> to vector<16xf32>
    %136 = vector.shape_cast %135 : vector<16xf32> to vector<16x1xf32>
    %cst_72 = arith.constant 3.200000e+01 : f32
    %137 = vector.broadcast %cst_72 : f32 to vector<16x1xf32>
    %138 = arith.divf %136, %137 : vector<16x1xf32>
    %139 = vector.broadcast %138 : vector<16x1xf32> to vector<16x32xf32>
    %140 = arith.subf %132, %139 : vector<16x32xf32>
    %141 = arith.mulf %140, %140 : vector<16x32xf32>
    %cst_73 = arith.constant dense<0.000000e+00> : vector<16xf32>
    %142 = vector.multi_reduction <add>, %141, %cst_73 [1] : vector<16x32xf32> to vector<16xf32>
    %143 = vector.shape_cast %142 : vector<16xf32> to vector<16x1xf32>
    %cst_74 = arith.constant 3.200000e+01 : f32
    %144 = vector.broadcast %cst_74 : f32 to vector<16x1xf32>
    %145 = arith.divf %143, %144 : vector<16x1xf32>
    %146 = vector.broadcast %138 : vector<16x1xf32> to vector<16x32xf32>
    %147 = arith.subf %132, %146 : vector<16x32xf32>
    %cst_75 = arith.constant 9.99999974E-6 : f32
    %148 = vector.broadcast %cst_75 : f32 to vector<16x1xf32>
    %149 = arith.addf %145, %148 : vector<16x1xf32>
    %150 = math.rsqrt %149 : vector<16x1xf32>
    %151 = vector.broadcast %150 : vector<16x1xf32> to vector<16x32xf32>
    %152 = arith.mulf %147, %151 : vector<16x32xf32>
    %153 = vector.broadcast %133 : vector<1x32xf32> to vector<16x32xf32>
    %154 = arith.mulf %152, %153 : vector<16x32xf32>
    %155 = vector.broadcast %134 : vector<1x32xf32> to vector<16x32xf32>
    %156 = arith.addf %154, %155 : vector<16x32xf32>
    %c0_76 = arith.constant 0 : index
    %c0_77 = arith.constant 0 : index
    %157 = vector.load %arg13[%c0_76, %c0_77] : memref<16x32xf32, #tpu.memory_space<vmem>>, vector<16x32xf32>
    tpu.vector_store %arg13[%c0_76, %c0_77], %156 {strides = array<i32>} : memref<16x32xf32, #tpu.memory_space<vmem>>, vector<16x32xf32>,
    return
  }
}

</mosaic_0001>

<bundles_post_ra>
// kernel: tpu_custom_call.1
= control target key start
LH: loop header
LB: loop body
LE: loop exit
PB: predicated region body
PF: predicated region fallthrough
CT: control target
= control target key end

     0   :  { %18 = vsyncpa [#allocation4], 0  ;;  %s2613_s0 = inlined_call_operand.hbm [shape: f32[16,32], index: 0, kind: input, shape index: {}]   ;;  %s2614_s1 = inlined_call_operand.vmem [shape: f32[32,96], index: 1, kind: input, shape index: {}]   ;;  %s2615_s2 = inlined_call_operand.vmem [shape: f32[1,96], index: 2, kind: input, shape index: {}]   ;;  %s2616_s3 = inlined_call_operand.vmem [shape: f32[32,32], index: 3, kind: input, shape index: {}]   ;;  %s2617_s4 = inlined_call_operand.vmem [shape: f32[1,32], index: 4, kind: input, shape index: {}]   ;;  %s2618_s5 = inlined_call_operand.vmem [shape: f32[1,32], index: 5, kind: input, shape index: {}]   ;;  %s2619_s6 = inlined_call_operand.vmem [shape: f32[1,32], index: 6, kind: input, shape index: {}]   ;;  %s2620_s7 = inlined_call_operand.vmem [shape: f32[32,64], index: 7, kind: input, shape index: {}]   ;;  %s2621_s8 = inlined_call_operand.vmem [shape: f32[1,64], index: 8, kind: input, shape index: {}]   ;;  %s2622_s9 = inlined_call_operand.vmem [shape: f32[64,32], index: 9, kind: input, shape index: {}]   ;;  %s2623_s10 = inlined_call_operand.vmem [shape: f32[1,32], index: 10, kind: input, shape index: {}]   ;;  %s2624_s11 = inlined_call_operand.vmem [shape: f32[1,32], index: 11, kind: input, shape index: {}]   ;;  %s2625_s12 = inlined_call_operand.vmem [shape: f32[1,32], index: 12, kind: input, shape index: {}]   ;;  %s2626_s13 = inlined_call_operand.hbm [shape: f32[16,32], index: 13, kind: output, shape index: {}]  }
   0x1   :  { %19 = vsyncpa [#allocation5], 0  ;;  %s2268_s25 = smov [#allocation3]  }
   0x2   :  { %s25_s26 = sshll.u32 %s2268_s25, 4  ;;  %s26_s26 = int_to_ptr.vmem [resolvable:$true] %s25_s26 }
   0x3   :  { %s2232_s27 = scalar_lea.vmem %s26_s26, 256  ;;  %p2237_p1 = scmp.lt.s32.totalorder %s26_s26, %s26_s26 }
   0x4   :  { %p2233_p0 = scmp.ne.s32.totalorder %s26_s26, %s2232_s27  ;;  %p2238_p2 = scmp.lt.s32.totalorder %s2232_s27, %s2232_s27 }
   0x6   :  { %p2239_p3 = por %p2238_p2, %p2237_p1 }
   0x8   :  { %p2240_p4 = pnand %p2239_p3, %p2233_p0 }
   0xa   :  { %2243 = shalt.err (!%p2240_p4)
}
   0xb   :  { %s2269_s28 = smov 128   ;;  %s2270_s29 = smov 8  }
   0xc   :  { %31 = dma.hbm_to_vmem [thread:$0]  %s2613_s0, 256, %s26_s26, [#allocation4], %s2269_s28, %s2269_s28, %s2270_s29  }
   0xd   :  { %2264 = dma.done.wait [#allocation4], 256  }
   0xe   :  { %2265 = vsyncadd [#allocation4], 4294967040  ;;  %vm72_vm0 = vcmask 261120   ;;  %v64_v0 = vld [vmem:[%s2614_s1 + $0x18] sm:$0xff]  ;;  %v63_v1 = vld [vmem:[%s2614_s1 + $0x10] sm:$0xff]  ;;  %v2271_v6 = vmov 0.0  }
   0xf   :  { %2029 = vmatprep.subr.mxu1 %v64_v0  ;;  %v2369_v2 = vld [vmem:[#allocation3] sm:$0xff]  ;;  %v62_v3 = vld [vmem:[%s2614_s1 + $0x8] sm:$0xff]  ;;  %v61_v4 = vld [vmem:[%s2614_s1] sm:$0xff]  ;;  %2050 = vmatprep.subr.mxu0 %v2271_v6  ;;  %vm2272_vm1 = vmmov 0   ;;  %s2273_s23 = smov 88   ;;  %s2274_s24 = smov 96  }
  0x10   :  { %2030 = vmatpush3.msra.mxu1 %v64_v0  ;;  %2037 = vmatprep.mubr.msk.f32.mxu1 %vm72_vm0, %v2369_v2  ;;  %v2379_v5 = vld [vmem:[#allocation3 + $0x8] sm:$0xff]  ;;  %v1929_v7 = vld [vmem:[%s2615_s2] ss:$0 sm:$0xff]  ;;  %s2275_s25 = smov 120   ;;  %s2276_s26 = smov 80   ;;  %vm157_vm2 = vcmask 64512  }
  0x11   :  { %2031 = vmatprep.subr.mxu1 %v63_v1  ;;  %2052 = vmatprep.mubr.msk.f32.mxu0 %vm2272_vm1, %v2271_v6  ;;  %s2277_s2 = smov 112   ;;  %s2278_s27 = smov 72   ;;  %vm1030_vm3 = vcmask 130112   ;;  %vm1112_vm4 = vcmask 195712   ;;  %vm1194_vm5 = vcmask 261312   ;;  %vm1782_vm6 = vcmask 523264  }
  0x12   :  { %2032 = vmatpush3.msra.mxu1 %v63_v1  ;;  %s2279_s30 = smov 104   ;;  %s2280_s14 = smov 64  }
  0x13   :  { %2033 = vmatprep.subr.mxu1 %v62_v3  ;;  %s2281_s15 = smov 48   ;;  %s2282_s16 = smov 56  }
  0x14   :  { %2034 = vmatpush3.msra.mxu1 %v62_v3  ;;  %s2283_s17 = smov 40   ;;  %s2284_s18 = smov 16  }
  0x15   :  { %2035 = vmatprep.subr.mxu1 %v61_v4  ;;  %s2286_s20 = smov [#allocation6]  }
  0x16   :  { %2036 = vmatpush3.msra.mxu1 %v61_v4  ;;  %s1917_s0 = sshll.u32 %s2286_s20, 4  ;;  %s1918_s0 = int_to_ptr.vmem [resolvable:$true] %s1917_s0 }
  0x17   :  { %2038 = vmatmul.mubr.msk.f32.vlgmr.msra.gmra.mxu1 %vm72_vm0, %v2379_v5  ;;  %2040 = vmatprep.subr.mxu1 %v2271_v6  ;;  %p2249_p6 = scmp.lt.s32.totalorder %s1918_s0, %s1918_s0 }
  0x18   :  { %2042 = vmatprep.mubr.msk.f32.mxu1 %vm2272_vm1, %v2271_v6 }
  0xd7   :  { %v2039_v8 = vpop.f32.mrf.mxu1 }
  0xd8   :  { %v2392_v9 = vadd.f32 %v2039_v8, %v1929_v7 }
  0xd9   :  { %v145_v10 = vpop.f32.mrf.mxu1 }
  0xda   :  { %545 = vrot.lane.b32.xlu0 %v2392_v9, %s2273_s23  ;;  %467 = vrot.lane.b32.xlu1 %v2392_v9, %s2274_s24  ;;  %v2396_v11 = vadd.f32 %v1929_v7, %v145_v10 }
  0xde   :  { %232 = vrot.lane.b32.xlu1 %v2396_v11, %s2275_s25  ;;  %155 = vrot.lane.b32.xlu0 %v2396_v11, %s2274_s24 }
  0xe2   :  { %312 = vrot.lane.b32.xlu1 %v2396_v11, %s2276_s26  ;;  %234 = vrot.lane.b32.xlu0 %v2396_v11, %s2273_s23  ;;  %s2285_s23 = smov 24  }
  0xe6   :  { %310 = vrot.lane.b32.xlu1 %v2396_v11, %s2277_s2  ;;  %390 = vrot.lane.b32.xlu0 %v2396_v11, %s2278_s27 }
  0xea   :  { %543 = vrot.lane.b32.xlu1 %v2392_v9, %s2275_s25  ;;  %388 = vrot.lane.b32.xlu0 %v2396_v11, %s2279_s30 }
  0xee   :  { %701 = vrot.lane.b32.xlu1 %v2392_v9, %s2278_s27  ;;  %623 = vrot.lane.b32.xlu0 %v2392_v9, %s2276_s26 }
  0xf2   :  { %699 = vrot.lane.b32.xlu1 %v2392_v9, %s2279_s30  ;;  %621 = vrot.lane.b32.xlu0 %v2392_v9, %s2277_s2 }
 0x14c   :  { %v546_v12 = vpop.permute.xlu0 %545  ;;  %v468_v13 = vpop.permute.xlu1 %467 }
 0x150   :  { %v233_v14 = vpop.permute.xlu1 %232  ;;  %v156_v15 = vpop.permute.xlu0 %155 }
 0x151   :  { %2041 = vmatpush3.xpose.msk.msra.mxu1 %vm157_vm2, %v156_v15 }
 0x152   :  { %2045 = vmatprep.subr.mxu1 %v2271_v6 }
 0x154   :  { %v313_v16 = vpop.permute.xlu1 %312  ;;  %2043 = vmatmul.mubr.msk.f32.vlgmr.msra.gmra.mxu1 %vm157_vm2, %v2396_v11  ;;  %v235_v17 = vpop.permute.xlu0 %234 }
 0x155   :  { %2046 = vmatpush3.xpose.msk.msra.mxu1 %vm157_vm2, %v235_v17  ;;  %2051 = vmatpush3.xpose.msk.msra.mxu0 %vm157_vm2, %v313_v16 }
 0x156   :  { %2047 = vmatprep.mubr.msk.f32.mxu1 %vm2272_vm1, %v2271_v6  ;;  %2060 = vmatprep.subr.mxu0 %v2271_v6 }
 0x157   :  { %2055 = vmatprep.subr.mxu1 %v2271_v6 }
 0x158   :  { %v311_v18 = vpop.permute.xlu1 %310  ;;  %2048 = vmatmul.mubr.msk.f32.vlgmr.msra.gmra.mxu1 %vm157_vm2, %v233_v14  ;;  %v391_v19 = vpop.permute.xlu0 %390 }
 0x159   :  { %2053 = vmatmul.mubr.msk.f32.vlgmr.msra.gmra.mxu0 %vm157_vm2, %v311_v18  ;;  %2056 = vmatpush3.xpose.msk.msra.mxu1 %vm157_vm2, %v391_v19 }
 0x15a   :  { %2061 = vmatpush3.xpose.msk.msra.mxu0 %vm157_vm2, %v468_v13  ;;  %2062 = vmatprep.mubr.msk.f32.mxu0 %vm2272_vm1, %v2271_v6 }
 0x15b   :  { %2057 = vmatprep.mubr.msk.f32.mxu1 %vm2272_vm1, %v2271_v6  ;;  %2065 = vmatprep.subr.mxu1 %v2271_v6 }
 0x15c   :  { %v544_v20 = vpop.permute.xlu1 %543  ;;  %v389_v21 = vpop.permute.xlu0 %388  ;;  %2070 = vmatprep.subr.mxu0 %v2271_v6 }
 0x15d   :  { %2058 = vmatmul.mubr.msk.f32.vlgmr.msra.gmra.mxu1 %vm157_vm2, %v389_v21  ;;  %2063 = vmatmul.mubr.msk.f32.vlgmr.msra.gmra.mxu0 %vm157_vm2, %v2392_v9 }
 0x15e   :  { %2066 = vmatpush3.xpose.msk.msra.mxu1 %vm157_vm2, %v546_v12  ;;  %2067 = vmatprep.mubr.msk.f32.mxu1 %vm2272_vm1, %v2271_v6 }
 0x15f   :  { %2075 = vmatprep.subr.mxu1 %v2271_v6  ;;  %2072 = vmatprep.mubr.msk.f32.mxu0 %vm2272_vm1, %v2271_v6 }
 0x160   :  { %v702_v22 = vpop.permute.xlu1 %701  ;;  %v624_v23 = vpop.permute.xlu0 %623 }
 0x161   :  { %2068 = vmatmul.mubr.msk.f32.vlgmr.msra.gmra.mxu1 %vm157_vm2, %v544_v20  ;;  %2071 = vmatpush3.xpose.msk.msra.mxu0 %vm157_vm2, %v624_v23 }
 0x162   :  { %2076 = vmatpush3.xpose.msk.msra.mxu1 %vm157_vm2, %v702_v22  ;;  %2077 = vmatprep.mubr.msk.f32.mxu1 %vm2272_vm1, %v2271_v6 }
 0x163   :  { %2080 = vmatprep.subr.mxu0 %v2271_v6  ;;  %2085 = vmatprep.subr.mxu1 %v2271_v6 }
 0x164   :  { %v700_v24 = vpop.permute.xlu1 %699  ;;  %v622_v25 = vpop.permute.xlu0 %621 }
 0x165   :  { %2073 = vmatmul.mubr.msk.f32.vlgmr.msra.gmra.mxu0 %vm157_vm2, %v622_v25  ;;  %2078 = vmatmul.mubr.msk.f32.vlgmr.msra.gmra.mxu1 %vm157_vm2, %v700_v24 }
 0x166   :  { %2082 = vmatprep.mubr.msk.f32.mxu0 %vm2272_vm1, %v2271_v6  ;;  %2087 = vmatprep.mubr.msk.f32.mxu1 %vm2272_vm1, %v2271_v6 }
 0x214   :  { %v228_v26 = vpop.f32.mrf.mxu1 }
 0x215   :  { %v777_v27 = vmul.f32 0.35355338, %v228_v26 }
 0x216   :  { %v2044_v28 = vpop.f32.mrf.mxu1 }
 0x217   :  { %v785_v29 = vsel %vm157_vm2, %v777_v27, -inf }
 0x218   :  { %786 = vmax.xlane.f32.xlu0 %v785_v29  ;;  %v306_v30 = vpop.f32.mrf.mxu1 }
 0x219   :  { %v778_v31 = vmul.f32 0.35355338, %v306_v30  ;;  %v384_v32 = vpop.f32.mrf.mxu0 }
 0x21a   :  { %v779_v33 = vmul.f32 0.35355338, %v384_v32  ;;  %v2049_v34 = vpop.f32.mrf.mxu1 }
 0x21b   :  { %v2054_v35 = vpop.f32.mrf.mxu0  ;;  %v788_v36 = vsel %vm157_vm2, %v778_v31, -inf }
 0x21c   :  { %789 = vmax.xlane.f32.xlu1 %v788_v36  ;;  %v791_v37 = vsel %vm157_vm2, %v779_v33, -inf }
 0x21d   :  { %v539_v38 = vpop.f32.mrf.mxu0  ;;  %792 = vmax.xlane.f32.xlu0 %v791_v37  ;;  %v462_v39 = vpop.f32.mrf.mxu1 }
 0x21e   :  { %v781_v40 = vmul.f32 0.35355338, %v539_v38  ;;  %v780_v41 = vmul.f32 0.35355338, %v462_v39 }
 0x21f   :  { %v2059_v42 = vpop.f32.mrf.mxu1  ;;  %v2064_v43 = vpop.f32.mrf.mxu0 }
 0x220   :  { %v797_v44 = vsel %vm157_vm2, %v781_v40, -inf  ;;  %v794_v45 = vsel %vm157_vm2, %v780_v41, -inf }
 0x221   :  { %798 = vmax.xlane.f32.xlu1 %v797_v44  ;;  %795 = vmax.xlane.f32.xlu0 %v794_v45  ;;  %v617_v46 = vpop.f32.mrf.mxu1 }
 0x222   :  { %v782_v47 = vmul.f32 0.35355338, %v617_v46 }
 0x223   :  { %v2069_v48 = vpop.f32.mrf.mxu1 }
 0x224   :  { %v800_v49 = vsel %vm157_vm2, %v782_v47, -inf }
 0x225   :  { %801 = vmax.xlane.f32.xlu0 %v800_v49  ;;  %v695_v50 = vpop.f32.mrf.mxu0  ;;  %v773_v51 = vpop.f32.mrf.mxu1 }
 0x226   :  { %v783_v52 = vmul.f32 0.35355338, %v695_v50  ;;  %v784_v53 = vmul.f32 0.35355338, %v773_v51 }
 0x227   :  { %v2074_v54 = vpop.f32.mrf.mxu0  ;;  %v2079_v55 = vpop.f32.mrf.mxu1 }
 0x228   :  { %v806_v56 = vsel %vm157_vm2, %v784_v53, -inf  ;;  %v803_v57 = vsel %vm157_vm2, %v783_v52, -inf }
 0x229   :  { %807 = vmax.xlane.f32.xlu0 %v806_v56  ;;  %804 = vmax.xlane.f32.xlu1 %v803_v57 }
 0x23a   :  { %873 = vrot.lane.b32.xlu1 %v2396_v11, %s2280_s14 }
 0x23e   :  { %1032 = vrot.lane.b32.xlu1 %v2396_v11, %s2281_s15 }
 0x23f   :  { %950 = vrot.lane.b32.xlu0 %v2396_v11, %s2282_s16 }
 0x242   :  { %1114 = vrot.lane.b32.xlu1 %v2396_v11, %s2283_s17 }
 0x243   :  { %1196 = vrot.lane.b32.xlu0 %v2392_v9, %s2280_s14 }
 0x246   :  { %1273 = vrot.lane.b32.xlu1 %v2392_v9, %s2282_s16 }
 0x2a1   :  { %v787_v58 = vpop.xlane.xlu0 %786 }
 0x2a2   :  { %v809_v59 = vsub.f32 %v777_v27, %v787_v58 }
 0x2a4   :  { %v817_v60 = vmul.f32 1.442695, %v809_v59 }
 0x2a5   :  { %v790_v61 = vpop.xlane.xlu1 %789 }
 0x2a6   :  { %2180 = vpow2.f32 %v817_v60  ;;  %v810_v62 = vsub.f32 %v778_v31, %v790_v61  ;;  %v793_v63 = vpop.xlane.xlu0 %792 }
 0x2a7   :  { %v811_v0 = vsub.f32 %v779_v33, %v793_v63 }
 0x2a8   :  { %v819_v1 = vmul.f32 1.442695, %v810_v62 }
 0x2a9   :  { %v821_v3 = vmul.f32 1.442695, %v811_v0 }
 0x2aa   :  { %2182 = vpow2.f32 %v819_v1  ;;  %v799_v4 = vpop.xlane.xlu1 %798  ;;  %v796_v7 = vpop.xlane.xlu0 %795 }
 0x2ab   :  { %2184 = vpow2.f32 %v821_v3  ;;  %v813_v8 = vsub.f32 %v781_v40, %v799_v4  ;;  %v812_v10 = vsub.f32 %v780_v41, %v796_v7 }
 0x2ad   :  { %v825_v11 = vmul.f32 1.442695, %v813_v8  ;;  %v823_v12 = vmul.f32 1.442695, %v812_v10 }
 0x2ae   :  { %v802_v13 = vpop.xlane.xlu0 %801 }
 0x2af   :  { %2186 = vpow2.f32 %v825_v11  ;;  %v814_v14 = vsub.f32 %v782_v47, %v802_v13 }
 0x2b0   :  { %2188 = vpow2.f32 %v823_v12 }
 0x2b1   :  { %v827_v15 = vmul.f32 1.442695, %v814_v14  ;;  %v1521_v14 = vld [vmem:[%s2616_s3 + $0x18] sm:$0xff] }
 0x2b2   :  { %v805_v16 = vpop.xlane.xlu1 %804  ;;  %v808_v17 = vpop.xlane.xlu0 %807 }
 0x2b3   :  { %v2181_v18 = vpop.eup %2180  ;;  %2190 = vpow2.f32 %v827_v15  ;;  %v815_v19 = vsub.f32 %v783_v52, %v805_v16  ;;  %v816_v20 = vsub.f32 %v784_v53, %v808_v17  ;;  %v1520_v15 = vld [vmem:[%s2616_s3 + $0x10] sm:$0xff]  ;;  %v1519_v17 = vld [vmem:[%s2616_s3 + $0x8] sm:$0xff] }
 0x2b4   :  { %v833_v21 = vsel %vm157_vm2, %v2181_v18, 0.0 }
 0x2b5   :  { %v829_v22 = vmul.f32 1.442695, %v815_v19  ;;  %v831_v23 = vmul.f32 1.442695, %v816_v20  ;;  %834 = vadd.xlane.f32.xlu1 %v833_v21  ;;  %v1518_v20 = vld [vmem:[%s2616_s3] sm:$0xff] }
 0x2b6   :  { %v874_v24 = vpop.permute.xlu1 %873  ;;  %v951_v25 = vpop.permute.xlu0 %950 }
 0x2b7   :  { %v2183_v26 = vpop.eup %2182  ;;  %2192 = vpow2.f32 %v829_v22  ;;  %2081 = vmatpush3.msra.mxu0 %v874_v24  ;;  %2086 = vmatpush3.msra.mxu1 %v951_v25 }
 0x2b8   :  { %v2185_v27 = vpop.eup %2184  ;;  %2194 = vpow2.f32 %v831_v23  ;;  %v836_v28 = vsel %vm157_vm2, %v2183_v26, 0.0  ;;  %2090 = vmatprep.subr.mxu0 %v2271_v6  ;;  %2095 = vmatprep.subr.mxu1 %v2271_v6 }
 0x2b9   :  { %837 = vadd.xlane.f32.xlu0 %v836_v28  ;;  %v839_v29 = vsel %vm157_vm2, %v2185_v27, 0.0 }
 0x2ba   :  { %840 = vadd.xlane.f32.xlu1 %v839_v29  ;;  %v1033_v40 = vpop.permute.xlu1 %1032  ;;  %v1197_v43 = vpop.permute.xlu0 %1196 }
 0x2bc   :  { %v2187_v30 = vpop.eup %2186 }
 0x2bd   :  { %v2189_v31 = vpop.eup %2188  ;;  %v845_v32 = vsel %vm157_vm2, %v2187_v30, 0.0 }
 0x2be   :  { %846 = vadd.xlane.f32.xlu1 %v845_v32  ;;  %v842_v33 = vsel %vm157_vm2, %v2189_v31, 0.0  ;;  %v1115_v41 = vpop.permute.xlu1 %1114 }
 0x2bf   :  { %843 = vadd.xlane.f32.xlu0 %v842_v33 }
 0x2c0   :  { %v2191_v34 = vpop.eup %2190 }
 0x2c1   :  { %v848_v35 = vsel %vm157_vm2, %v2191_v34, 0.0 }
 0x2c2   :  { %v1274_v42 = vpop.permute.xlu1 %1273 }
 0x2c3   :  { %849 = vadd.xlane.f32.xlu0 %v848_v35 }
 0x2c4   :  { %v2476_v36 = vpop.eup %2192 }
 0x2c5   :  { %v2478_v37 = vpop.eup %2194  ;;  %v851_v38 = vsel %vm157_vm2, %v2476_v36, 0.0 }
 0x2c6   :  { %852 = vadd.xlane.f32.xlu1 %v851_v38  ;;  %v854_v39 = vsel %vm157_vm2, %v2478_v37, 0.0 }
 0x2c7   :  { %855 = vadd.xlane.f32.xlu0 %v854_v39 }
 0x2d7   :  { %1435 = vrot.lane.b32.xlu1 %v2392_v9, %s2283_s17 }
 0x2dd   :  { %1354 = vrot.lane.b32.xlu0 %v2392_v9, %s2281_s15 }
 0x33e   :  { %v835_v44 = vpop.xlane.xlu1 %834 }
 0x33f   :  { %2196 = vrcp.f32 %v835_v44 }
 0x342   :  { %v838_v45 = vpop.xlane.xlu0 %837 }
 0x343   :  { %2198 = vrcp.f32 %v838_v45  ;;  %v841_v46 = vpop.xlane.xlu1 %840 }
 0x344   :  { %2200 = vrcp.f32 %v841_v46 }
 0x347   :  { %v847_v47 = vpop.xlane.xlu1 %846 }
 0x348   :  { %2202 = vrcp.f32 %v847_v47  ;;  %v844_v48 = vpop.xlane.xlu0 %843 }
 0x349   :  { %2204 = vrcp.f32 %v844_v48 }
 0x34c   :  { %v2197_v49 = vpop.eup %2196  ;;  %v850_v50 = vpop.xlane.xlu0 %849 }
 0x34d   :  { %2206 = vrcp.f32 %v850_v50  ;;  %v865_v51 = vmul.f32 %v2197_v49, %v2181_v18 }
 0x34f   :  { %2083 = vmatmul.mubr.msk.f32.vlgmr.msra.gmra.mxu0 %vm157_vm2, %v865_v51  ;;  %v853_v9 = vpop.xlane.xlu1 %852 }
 0x350   :  { %v2199_v52 = vpop.eup %2198  ;;  %2091 = vmatpush3.msra.mxu0 %v1033_v40  ;;  %2208 = vrcp.f32 %v853_v9  ;;  %v856_v53 = vpop.xlane.xlu0 %855  ;;  %2092 = vmatprep.mubr.msk.f32.mxu0 %vm2272_vm1, %v2271_v6 }
 0x351   :  { %v2201_v54 = vpop.eup %2200  ;;  %2210 = vrcp.f32 %v856_v53  ;;  %2100 = vmatprep.subr.mxu0 %v2271_v6  ;;  %v866_v55 = vmul.f32 %v2199_v52, %v2183_v26  ;;  %v1659_v53 = vld [vmem:[%s2620_s7 + $0x10] sm:$0xff] }
 0x352   :  { %v867_v56 = vmul.f32 %v2201_v54, %v2185_v27  ;;  %v1658_v54 = vld [vmem:[%s2620_s7 + $0x8] sm:$0xff] }
 0x353   :  { %2088 = vmatmul.mubr.msk.f32.vlgmr.msra.gmra.mxu1 %vm157_vm2, %v866_v55  ;;  %v1436_v1 = vpop.permute.xlu1 %1435  ;;  %v1657_v55 = vld [vmem:[%s2620_s7] sm:$0xff] }
 0x354   :  { %2096 = vmatpush3.msra.mxu1 %v1115_v41  ;;  %2093 = vmatmul.mubr.msk.f32.vlgmr.msra.gmra.mxu0 %vm157_vm2, %v867_v56  ;;  %v1355_v61 = vpop.permute.xlu0 %1354 }
 0x355   :  { %v2203_v57 = vpop.eup %2202  ;;  %2101 = vmatpush3.msra.mxu0 %v1197_v43  ;;  %2097 = vmatprep.mubr.msk.f32.mxu1 %vm2272_vm1, %v2271_v6 }
 0x356   :  { %v2205_v58 = vpop.eup %2204  ;;  %2102 = vmatprep.mubr.msk.f32.mxu0 %vm2272_vm1, %v2271_v6  ;;  %2105 = vmatprep.subr.mxu1 %v2271_v6  ;;  %v869_v59 = vmul.f32 %v2203_v57, %v2187_v30 }
 0x357   :  { %2110 = vmatprep.subr.mxu0 %v2271_v6  ;;  %v868_v60 = vmul.f32 %v2205_v58, %v2189_v31 }
 0x358   :  { %2103 = vmatmul.mubr.msk.f32.vlgmr.msra.gmra.mxu0 %vm157_vm2, %v869_v59 }
 0x359   :  { %2098 = vmatmul.mubr.msk.f32.vlgmr.msra.gmra.mxu1 %vm157_vm2, %v868_v60  ;;  %2111 = vmatpush3.msra.mxu0 %v1355_v61 }
 0x35a   :  { %v2207_v62 = vpop.eup %2206  ;;  %2106 = vmatpush3.msra.mxu1 %v1274_v42  ;;  %2107 = vmatprep.mubr.msk.f32.mxu1 %vm2272_vm1, %v2271_v6 }
 0x35b   :  { %2115 = vmatprep.subr.mxu1 %v2271_v6  ;;  %v870_v63 = vmul.f32 %v2207_v62, %v2191_v34  ;;  %2112 = vmatprep.mubr.msk.f32.mxu0 %vm2272_vm1, %v2271_v6 }
 0x35c   :  { %2120 = vmatprep.subr.mxu0 %v1521_v14 }
 0x35d   :  { %v2209_v0 = vpop.eup %2208  ;;  %2108 = vmatmul.mubr.msk.f32.vlgmr.msra.gmra.mxu1 %vm157_vm2, %v870_v63  ;;  %v1959_v63 = vld [vmem:[%s2618_s5] ss:$0 sm:$0xff] }
 0x35e   :  { %v2211_v3 = vpop.eup %2210  ;;  %2116 = vmatpush3.msra.mxu1 %v1436_v1  ;;  %2117 = vmatprep.mubr.msk.f32.mxu1 %vm2272_vm1, %v2271_v6  ;;  %v871_v4 = vmul.f32 %v2209_v0, %v2476_v36  ;;  %v1956_v36 = vld [vmem:[%s2617_s4] ss:$0 sm:$0xff] }
 0x35f   :  { %v872_v7 = vmul.f32 %v2211_v3, %v2478_v37  ;;  %v1960_v1 = vld [vmem:[%s2619_s6] ss:$0 sm:$0xff] }
 0x360   :  { %2113 = vmatmul.mubr.msk.f32.vlgmr.msra.gmra.mxu0 %vm157_vm2, %v871_v4 }
 0x361   :  { %2118 = vmatmul.mubr.msk.f32.vlgmr.msra.gmra.mxu1 %vm157_vm2, %v872_v7  ;;  %2121 = vmatpush3.msra.mxu0 %v1521_v14  ;;  %v1771_v14 = vld [vmem:[%s2622_s9 + $0x20] sm:$0xff] }
 0x362   :  { %2122 = vmatprep.subr.mxu0 %v1520_v15 }
 0x363   :  { %2123 = vmatpush3.msra.mxu0 %v1520_v15  ;;  %v1770_v15 = vld [vmem:[%s2622_s9 + $0x18] sm:$0xff] }
 0x364   :  { %2124 = vmatprep.subr.mxu0 %v1519_v17 }
 0x365   :  { %2125 = vmatpush3.msra.mxu0 %v1519_v17  ;;  %v1768_v17 = vld [vmem:[%s2622_s9 + $0x8] sm:$0xff] }
 0x366   :  { %2126 = vmatprep.subr.mxu0 %v1518_v20 }
 0x367   :  { %2127 = vmatpush3.msra.mxu0 %v1518_v20 }
 0x40f   :  { %v945_v8 = vpop.f32.mrf.mxu0 }
 0x410   :  { %949 = vst.msk [vmem:[#allocation2] sm:$0xff] %vm157_vm2, %v945_v8 }
 0x411   :  { %v2084_v10 = vpop.f32.mrf.mxu0 }
 0x413   :  { %v1022_v11 = vpop.f32.mrf.mxu1 }
 0x414   :  { %v1104_v12 = vpop.f32.mrf.mxu0  ;;  %1027 = vrot.lane.b32.xlu0 %v1022_v11, %s2270_s29 }
 0x415   :  { %1109 = vrot.lane.b32.xlu1 %v1104_v12, %s2284_s18  ;;  %v2089_v13 = vpop.f32.mrf.mxu1  ;;  %v1774_v12 = vld [vmem:[%s2622_s9 + $0x38] sm:$0xff] }
 0x416   :  { %v2094_v6 = vpop.f32.mrf.mxu0  ;;  %2142 = vmatprep.subr.mxu0 %v1774_v12  ;;  %v1773_v13 = vld [vmem:[%s2622_s9 + $0x30] sm:$0xff] }
 0x417   :  { %v1772_v6 = vld [vmem:[%s2622_s9 + $0x28] sm:$0xff] }
 0x418   :  { %v1268_v16 = vpop.f32.mrf.mxu0 }
 0x419   :  { %v1186_v18 = vpop.f32.mrf.mxu1  ;;  %1272 = vst.msk [vmem:[#allocation2 + $0x8] sm:$0xff] %vm157_vm2, %v1268_v16  ;;  %v1769_v16 = vld [vmem:[%s2622_s9 + $0x10] sm:$0xff] }
 0x41a   :  { %1191 = vrot.lane.b32.xlu1 %v1186_v18, %s2285_s23  ;;  %v2104_v19 = vpop.f32.mrf.mxu0  ;;  %v1767_v18 = vld [vmem:[%s2622_s9] sm:$0xff] }
 0x41b   :  { %v2099_v21 = vpop.f32.mrf.mxu1  ;;  %v1961_v19 = vld [vmem:[%s2621_s8] ss:$0 sm:$0xff] }
 0x41d   :  { %v1345_v22 = vpop.f32.mrf.mxu1 }
 0x41e   :  { %1350 = vrot.lane.b32.xlu0 %v1345_v22, %s2270_s29 }
 0x41f   :  { %v2109_v23 = vpop.f32.mrf.mxu1 }
 0x420   :  { %v1426_v24 = vpop.f32.mrf.mxu0 }
 0x421   :  { %v1507_v25 = vpop.f32.mrf.mxu1 }
 0x422   :  { %1512 = vrot.lane.b32.xlu1 %v1507_v25, %s2285_s23  ;;  %1431 = vrot.lane.b32.xlu0 %v1426_v24, %s2284_s18  ;;  %v2114_v26 = vpop.f32.mrf.mxu0 }
 0x423   :  { %v2119_v27 = vpop.f32.mrf.mxu1 }
 0x486   :  { %v1028_v28 = vpop.permute.xlu0 %1027 }
 0x487   :  { %1031 = vst.msk [vmem:[#allocation2] sm:$0xff] %vm1030_vm3, %v1028_v28  ;;  %v1110_v29 = vpop.permute.xlu1 %1109 }
 0x488   :  { %1113 = vst.msk [vmem:[#allocation2] sm:$0xff] %vm1112_vm4, %v1110_v29 }
 0x48c   :  { %v1192_v30 = vpop.permute.xlu1 %1191 }
 0x48d   :  { %1195 = vst.msk [vmem:[#allocation2] sm:$0xff] %vm1194_vm5, %v1192_v30 }
 0x490   :  { %v1351_v31 = vpop.permute.xlu0 %1350 }
 0x491   :  { %1353 = vst.msk [vmem:[#allocation2 + $0x8] sm:$0xff] %vm1030_vm3, %v1351_v31 }
 0x494   :  { %v1513_v32 = vpop.permute.xlu1 %1512  ;;  %v1432_v33 = vpop.permute.xlu0 %1431  ;;  %v1516_v34 = vld [vmem:[#allocation2] sm:$0xff] }
 0x495   :  { %1434 = vst.msk [vmem:[#allocation2 + $0x8] sm:$0xff] %vm1112_vm4, %v1432_v33  ;;  %2128 = vmatprep.mubr.msk.f32.mxu0 %vm72_vm0, %v1516_v34 }
 0x496   :  { %1515 = vst.msk [vmem:[#allocation2 + $0x8] sm:$0xff] %vm1194_vm5, %v1513_v32 }
 0x49d   :  { %v1517_v35 = vld [vmem:[#allocation2 + $0x8] sm:$0xff] }
 0x49e   :  { %2129 = vmatmul.mubr.msk.f32.vlgmr.msra.gmra.mxu0 %vm72_vm0, %v1517_v35 }
 0x49f   :  { %2143 = vmatpush3.msra.mxu0 %v1774_v12 }
 0x4a0   :  { %2144 = vmatprep.subr.mxu0 %v1773_v13 }
 0x4a1   :  { %2145 = vmatpush3.msra.mxu0 %v1773_v13 }
 0x4a2   :  { %2146 = vmatprep.subr.mxu0 %v1772_v6 }
 0x4a3   :  { %2147 = vmatpush3.msra.mxu0 %v1772_v6 }
 0x4a4   :  { %2148 = vmatprep.subr.mxu0 %v1771_v14 }
 0x4a5   :  { %2149 = vmatpush3.msra.mxu0 %v1771_v14 }
 0x4a6   :  { %2150 = vmatprep.subr.mxu0 %v1770_v15 }
 0x4a7   :  { %2151 = vmatpush3.msra.mxu0 %v1770_v15 }
 0x4a8   :  { %2152 = vmatprep.subr.mxu0 %v1769_v16 }
 0x4a9   :  { %2153 = vmatpush3.msra.mxu0 %v1769_v16 }
 0x4aa   :  { %2154 = vmatprep.subr.mxu0 %v1768_v17 }
 0x4ab   :  { %2155 = vmatpush3.msra.mxu0 %v1768_v17 }
 0x4ac   :  { %2156 = vmatprep.subr.mxu0 %v1767_v18 }
 0x4ad   :  { %2157 = vmatpush3.msra.mxu0 %v1767_v18 }
 0x55e   :  { %v2130_v37 = vpop.f32.mrf.mxu0 }
 0x55f   :  { %v1607_v38 = vadd.f32 %v2130_v37, %v1956_v36 }
 0x560   :  { %v1601_v39 = vpop.f32.mrf.mxu0 }
 0x561   :  { %v1602_v40 = vadd.f32 %v1956_v36, %v1601_v39  ;;  %v1611_v41 = vadd.f32 %v1607_v38, %v2379_v5 }
 0x563   :  { %v1617_v42 = vsel %vm72_vm0, %v1611_v41, 0.0  ;;  %v1610_v43 = vadd.f32 %v1602_v40, %v2369_v2  ;;  %v1660_v2 = vld [vmem:[%s2620_s7 + $0x18] sm:$0xff]  ;;  %s2244_s7 = scalar_lea.vmem %s1918_s0, 256 }
 0x564   :  { %1618 = vadd.xlane.f32.xlu1 %v1617_v42  ;;  %2131 = vmatprep.subr.mxu1 %v1660_v2  ;;  %v1964_v42 = vld [vmem:[%s2623_s10] ss:$0 sm:$0xff]  ;;  %p2245_p5 = scmp.ne.s32.totalorder %s1918_s0, %s2244_s7  ;;  %p2250_p7 = scmp.lt.s32.totalorder %s2244_s7, %s2244_s7 }
 0x565   :  { %v1614_v44 = vsel %vm72_vm0, %v1610_v43, 0.0  ;;  %2132 = vmatpush3.msra.mxu1 %v1660_v2 }
 0x566   :  { %1615 = vadd.xlane.f32.xlu0 %v1614_v44  ;;  %2133 = vmatprep.subr.mxu1 %v1659_v53  ;;  %p2251_p8 = por %p2250_p7, %p2249_p6 }
 0x567   :  { %2134 = vmatpush3.msra.mxu1 %v1659_v53 }
 0x568   :  { %2135 = vmatprep.subr.mxu1 %v1658_v54  ;;  %p2252_p9 = pnand %p2251_p8, %p2245_p5 }
 0x569   :  { %2136 = vmatpush3.msra.mxu1 %v1658_v54 }
 0x56a   :  { %2137 = vmatprep.subr.mxu1 %v1657_v55 }
 0x56b   :  { %2138 = vmatpush3.msra.mxu1 %v1657_v55 }
 0x5ed   :  { %v1619_v45 = vpop.xlane.xlu1 %1618 }
 0x5ee   :  { %v1622_v46 = vmul.f32 0.03125, %v1619_v45 }
 0x5ef   :  { %v1616_v47 = vpop.xlane.xlu0 %1615 }
 0x5f0   :  { %v1621_v48 = vmul.f32 0.03125, %v1616_v47  ;;  %v1624_v49 = vsub.f32 %v1611_v41, %v1622_v46 }
 0x5f2   :  { %v1623_v50 = vsub.f32 %v1610_v43, %v1621_v48  ;;  %v1626_v52 = vmul.f32 %v1624_v49, %v1624_v49 }
 0x5f4   :  { %v1625_v51 = vmul.f32 %v1623_v50, %v1623_v50  ;;  %v1630_v5 = vsel %vm72_vm0, %v1626_v52, 0.0 }
 0x5f6   :  { %v1627_v9 = vsel %vm72_vm0, %v1625_v51, 0.0 }
 0x5f7   :  { %1628 = vadd.xlane.f32.xlu0 %v1627_v9 }
 0x5fb   :  { %1631 = vadd.xlane.f32.xlu0 %v1630_v5 }
 0x680   :  { %v1629_v56 = vpop.xlane.xlu0 %1628 }
 0x681   :  { %v1633_v57 = vmul.f32 0.03125, %v1629_v56 }
 0x683   :  { %v1635_v58 = vadd.f32 1e-05, %v1633_v57 }
 0x684   :  { %v1632_v59 = vpop.xlane.xlu0 %1631 }
 0x685   :  { %2212 = vrsqrt.f32 %v1635_v58  ;;  %v1634_v60 = vmul.f32 0.03125, %v1632_v59 }
 0x687   :  { %v1636_v61 = vadd.f32 1e-05, %v1634_v60 }
 0x689   :  { %2214 = vrsqrt.f32 %v1636_v61 }
 0x692   :  { %v2213_v62 = vpop.eup %2212 }
 0x693   :  { %v1639_v0 = vmul.f32 %v2213_v62, %v1623_v50 }
 0x695   :  { %v1647_v3 = vmul.f32 %v1959_v63, %v1639_v0 }
 0x696   :  { %v2215_v4 = vpop.eup %2214 }
 0x697   :  { %v1640_v7 = vmul.f32 %v2215_v4, %v1624_v49  ;;  %v2559_v8 = vadd.f32 %v1960_v1, %v1647_v3 }
 0x699   :  { %v1648_v10 = vmul.f32 %v1959_v63, %v1640_v7  ;;  %2139 = vmatprep.mubr.msk.f32.mxu1 %vm72_vm0, %v2559_v8  ;;  %v1968_v7 = vld [vmem:[%s2625_s12] ss:$0 sm:$0xff] }
 0x69b   :  { %v1656_v11 = vadd.f32 %v1960_v1, %v1648_v10  ;;  %v1967_v1 = vld [vmem:[%s2624_s11] ss:$0 sm:$0xff] }
 0x69d   :  { %2140 = vmatmul.mubr.msk.f32.vlgmr.msra.gmra.mxu1 %vm72_vm0, %v1656_v11 }
 0x75d   :  { %v2141_v20 = vpop.f32.mrf.mxu1 }
 0x75e   :  { %v1746_v21 = vadd.f32 %v2141_v20, %v1961_v19 }
 0x75f   :  { %v1740_v22 = vpop.f32.mrf.mxu1 }
 0x760   :  { %v1750_v23 = vmul.f32 %v1746_v21, %v1746_v21  ;;  %v1741_v24 = vadd.f32 %v1961_v19, %v1740_v22 }
 0x762   :  { %v1752_v25 = vmul.f32 %v1750_v23, %v1746_v21  ;;  %v1749_v26 = vmul.f32 %v1741_v24, %v1741_v24 }
 0x764   :  { %v1754_v27 = vmul.f32 0.044715, %v1752_v25  ;;  %v1751_v28 = vmul.f32 %v1749_v26, %v1741_v24 }
 0x766   :  { %v1756_v29 = vadd.f32 %v1754_v27, %v1746_v21  ;;  %v1753_v30 = vmul.f32 0.044715, %v1751_v28 }
 0x768   :  { %v1758_v31 = vmul.f32 0.7978846, %v1756_v29  ;;  %v1755_v32 = vadd.f32 %v1753_v30, %v1741_v24 }
 0x76a   :  { %2216 = vtanh.f32 %v1758_v31  ;;  %v1757_v33 = vmul.f32 0.7978846, %v1755_v32 }
 0x76c   :  { %2218 = vtanh.f32 %v1757_v33 }
 0x777   :  { %v2217_v34 = vpop.eup %2216 }
 0x778   :  { %v1762_v35 = vadd.f32 1.0, %v2217_v34 }
 0x779   :  { %v2219_v36 = vpop.eup %2218 }
 0x77a   :  { %v1761_v37 = vadd.f32 1.0, %v2219_v36  ;;  %v1764_v38 = vmul.f32 0.5, %v1762_v35 }
 0x77c   :  { %v1763_v39 = vmul.f32 0.5, %v1761_v37  ;;  %v1766_v41 = vmul.f32 %v1764_v38, %v1746_v21 }
 0x77e   :  { %v1765_v40 = vmul.f32 %v1763_v39, %v1741_v24 }
 0x780   :  { %2158 = vmatprep.mubr.msk.f32.mxu0 %vm1782_vm6, %v1765_v40 }
 0x781   :  { %2159 = vmatmul.mubr.msk.f32.vlgmr.msra.gmra.mxu0 %vm1782_vm6, %v1766_v41 }
 0x841   :  { %v2160_v43 = vpop.f32.mrf.mxu0 }
 0x842   :  { %v1861_v44 = vadd.f32 %v2160_v43, %v1964_v42 }
 0x843   :  { %v1855_v45 = vpop.f32.mrf.mxu0 }
 0x844   :  { %v1856_v46 = vadd.f32 %v1964_v42, %v1855_v45  ;;  %v1865_v47 = vadd.f32 %v1861_v44, %v1656_v11 }
 0x846   :  { %v1871_v48 = vsel %vm72_vm0, %v1865_v47, 0.0  ;;  %v1864_v49 = vadd.f32 %v1856_v46, %v2559_v8 }
 0x847   :  { %1872 = vadd.xlane.f32.xlu0 %v1871_v48 }
 0x848   :  { %v1868_v50 = vsel %vm72_vm0, %v1864_v49, 0.0 }
 0x849   :  { %1869 = vadd.xlane.f32.xlu1 %v1868_v50 }
 0x8d0   :  { %v1873_v51 = vpop.xlane.xlu0 %1872 }
 0x8d1   :  { %v1875_v9 = vmul.f32 0.03125, %v1873_v51 }
 0x8d2   :  { %v1870_v52 = vpop.xlane.xlu1 %1869 }
 0x8d3   :  { %v1877_v5 = vsub.f32 %v1865_v47, %v1875_v9  ;;  %v1874_v2 = vmul.f32 0.03125, %v1870_v52 }
 0x8d5   :  { %v1876_v53 = vsub.f32 %v1864_v49, %v1874_v2  ;;  %v1879_v54 = vmul.f32 %v1877_v5, %v1877_v5 }
 0x8d7   :  { %v1883_v55 = vsel %vm72_vm0, %v1879_v54, 0.0  ;;  %v1878_v56 = vmul.f32 %v1876_v53, %v1876_v53 }
 0x8d8   :  { %1884 = vadd.xlane.f32.xlu0 %v1883_v55 }
 0x8d9   :  { %v1880_v57 = vsel %vm72_vm0, %v1878_v56, 0.0 }
 0x8da   :  { %1881 = vadd.xlane.f32.xlu1 %v1880_v57 }
 0x961   :  { %v1885_v58 = vpop.xlane.xlu0 %1884 }
 0x962   :  { %v1887_v59 = vmul.f32 0.03125, %v1885_v58 }
 0x963   :  { %v1882_v60 = vpop.xlane.xlu1 %1881 }
 0x964   :  { %v1889_v61 = vadd.f32 1e-05, %v1887_v59  ;;  %v1886_v62 = vmul.f32 0.03125, %v1882_v60 }
 0x966   :  { %2220 = vrsqrt.f32 %v1889_v61  ;;  %v1888_v63 = vadd.f32 1e-05, %v1886_v62 }
 0x968   :  { %2222 = vrsqrt.f32 %v1888_v63 }
 0x973   :  { %v2221_v0 = vpop.eup %2220 }
 0x974   :  { %v1893_v3 = vmul.f32 %v2221_v0, %v1877_v5 }
 0x975   :  { %v2223_v4 = vpop.eup %2222 }
 0x976   :  { %v1892_v8 = vmul.f32 %v2223_v4, %v1876_v53  ;;  %v1901_v10 = vmul.f32 %v1967_v1, %v1893_v3 }
 0x978   :  { %v1900_v11 = vmul.f32 %v1967_v1, %v1892_v8  ;;  %v1909_v12 = vadd.f32 %v1968_v7, %v1901_v10 }
 0x97a   :  { %v1908_v13 = vadd.f32 %v1968_v7, %v1900_v11  ;;  %1911 = vst.msk [vmem:[#allocation6 + $0x8] sm:$0xff] %vm72_vm0, %v1909_v12 }
 0x97c   :  { %1910 = vst.msk [vmem:[#allocation6] sm:$0xff] %vm72_vm0, %v1908_v13 }
 0x97d   :  { %2255 = shalt.err (!%p2252_p9)
}
 0x97e   :  { %1923 = dma.vmem_to_hbm [thread:$0]  %s1918_s0, 256, %s2626_s13, [#allocation5], %s2269_s28, %s2269_s28, %s2270_s29  }
 0x97f   :  { %2266 = dma.done.wait [#allocation5], 256  }
 0x980   :  { %2267 = vsyncadd [#allocation5], 4294967040 }
 0x981   :  { %1927 = vsyncpa [#allocation4], 1 }
 0x982   :  { %1928 = vsyncpa [#allocation5], 1 }

</bundles_post_ra>
